<compile_context>
chip_gen: v7x
topology: tpu7x:2x2x1
jax: 0.10.0
libtpu: 0.0.40
codegen_flags: <defaults>
</compile_context>

<pallas_src>
import math
from typing import NamedTuple, Optional

import jax
import jax.numpy as jnp
from jax.experimental import pallas as pl
from jax.experimental.pallas import tpu as pltpu

MIN_VALUE = 0.2
MAX_VALUE = 0.4

_SUBLANE = 8
_LANE = 128
# Keep the double-buffered working set inside the smallest default scoped-VMEM
# budget across generations (v5e: 16 MiB scoped default).
_VMEM_BUDGET_BYTES = 14 * 1024 * 1024
# Below this many MACs the fixed pallas_call / padding overhead dominates.
_SMALL_PROBLEM_MACS = 1 << 18


def _round_up(v, m):
    return ((v + m - 1) // m) * m


def _pick_tile(extent, align, target):
    """Largest multiple of `align` that divides `extent` and is <= target."""
    target = max(target, align)
    best = align
    n_units = extent // align
    for t_units in range(1, n_units + 1):
        t = t_units * align
        if t > target:
            break
        if extent % t == 0:
            best = t
    return best


class LinearClampParams(NamedTuple):
    w_t_padded: jax.Array   # (Kp, Np) lane-aligned, padded once at prep time
    b_padded: jax.Array     # (1, Np)
    w_t: jax.Array          # (K, N) unpadded (small-shape fast path)
    b_row: jax.Array        # (1, N) unpadded (small-shape fast path)
    k_in: int
    n_out: int


def prepare_params(w, b, compute_dtype: Optional[jnp.dtype] = None):
    """One-time parameter prep (off the per-call path).

    w: torch-layout weight (out_features, in_features); b: (out_features,).
    Transposes once, pads K/N up to (8,128) lane alignment once, optionally
    casts the weight to a bf16 compute dtype.
    """
    n_out, k_in = w.shape
    w_t = jnp.asarray(w).T                      # (K, N)
    b_row = jnp.asarray(b).reshape(1, n_out)    # (1, N)
    if compute_dtype is not None:
        w_t = w_t.astype(compute_dtype)
    kp = _round_up(k_in, _LANE)
    np_ = _round_up(n_out, _LANE)
    w_t_p, b_p = w_t, b_row
    if (kp, np_) != (k_in, n_out):
        w_t_p = jnp.pad(w_t, ((0, kp - k_in), (0, np_ - n_out)))
    if np_ != n_out:
        b_p = jnp.pad(b_row, ((0, 0), (0, np_ - n_out)))
    return LinearClampParams(w_t_p, b_p, w_t, b_row, k_in, n_out)


def _linear_clamp_kernel_inplace(x_ref, w_ref, b_ref, o_ref):
    # f32 output: accumulate straight into the resident output block.
    # NOTE: only valid because k (axis 2) is the innermost, sequentially
    # executed ("arbitrary") axis and the output block index is constant
    # across k — keep that invariant if the grid is ever reordered.
    k = pl.program_id(2)

    @pl.when(k == 0)
    def _init():
        o_ref[...] = jnp.zeros_like(o_ref)

    o_ref[...] += jnp.dot(
        x_ref[...], w_ref[...], preferred_element_type=jnp.float32
    )

    @pl.when(k == pl.num_programs(2) - 1)
    def _finalize():
        # bias broadcast over rows, then clamp_min(0.2)+clamp_max(0.4).
        o_ref[...] = jnp.clip(o_ref[...] + b_ref[...], MIN_VALUE, MAX_VALUE)


def _linear_clamp_kernel_scratch(x_ref, w_ref, b_ref, o_ref, acc_ref):
    # Generic path (non-f32 outputs): f32 VMEM accumulator + cast at store.
    k = pl.program_id(2)

    @pl.when(k == 0)
    def _init():
        acc_ref[...] = jnp.zeros_like(acc_ref)

    acc_ref[...] += jnp.dot(
        x_ref[...], w_ref[...], preferred_element_type=jnp.float32
    )

    @pl.when(k == pl.num_programs(2) - 1)
    def _finalize():
        y = jnp.clip(acc_ref[...] + b_ref[...], MIN_VALUE, MAX_VALUE)
        o_ref[...] = y.astype(o_ref.dtype)


def linear_clamp(x, params: LinearClampParams, *,
                 tile_targets=(512, 512, 1024), use_pallas=None):
    """y = clip(x @ W^T + b, MIN_VALUE, MAX_VALUE) with prepared params."""
    B, K = x.shape
    assert K == params.k_in, "x feature dim does not match prepared weight"
    N = params.n_out
    out_dtype = x.dtype

    if use_pallas is None:
        use_pallas = B * K * N >= _SMALL_PROBLEM_MACS
    if not use_pallas:
        # Tiny-shape fast path: launch/padding overhead would dominate.
        y = x.astype(params.w_t.dtype) @ params.w_t + params.b_row
        return jnp.clip(y, MIN_VALUE, MAX_VALUE).astype(out_dtype)

    w_t = params.w_t_padded
    b = params.b_padded
    Kp, Np = w_t.shape

    # Only x is padded per call; weight/bias were padded once at prep time.
    if x.dtype != w_t.dtype:
        x = x.astype(w_t.dtype)        # optional bf16 compute path
    Bp = _round_up(B, _SUBLANE)
    if (Bp, Kp) != (B, K):
        x = jnp.pad(x, ((0, Bp - B), (0, Kp - K)))

    in_size = jnp.dtype(w_t.dtype).itemsize
    out_size = jnp.dtype(out_dtype).itemsize
    use_scratch = jnp.dtype(out_dtype) != jnp.dtype(jnp.float32)

    # Tiles divide the (8,128)-padded extents exactly (no tile-multiple pad).
    tm = _pick_tile(Bp, _SUBLANE, tile_targets[0])
    tn = _pick_tile(Np, _LANE, tile_targets[1])
    tk = _pick_tile(Kp, _LANE, tile_targets[2])

    # Megacore (v7x): ensure at least one "parallel" axis has >= 2 blocks.
    if Bp // tm == 1 and Np // tn == 1 and Np >= 2 * _LANE:
        tn = _pick_tile(Np, _LANE, tn // 2)

    def vmem_bytes(tm_, tn_, tk_):
        buf = 2 * (tm_ * tk_ + tk_ * tn_ + tn_) * in_size   # x, w, b (2x buffered)
        buf += 2 * tm_ * tn_ * out_size                      # output (2x buffered)
        if use_scratch:
            buf += tm_ * tn_ * 4                             # f32 accumulator
        return buf

    # Shrink K, then N, then M tiles if the working set would blow scoped VMEM.
    while vmem_bytes(tm, tn, tk) > _VMEM_BUDGET_BYTES and tk > _LANE:
        tk = _pick_tile(Kp, _LANE, tk // 2)
    while vmem_bytes(tm, tn, tk) > _VMEM_BUDGET_BYTES and tn > _LANE:
        tn = _pick_tile(Np, _LANE, tn // 2)
    while vmem_bytes(tm, tn, tk) > _VMEM_BUDGET_BYTES and tm > _SUBLANE:
        tm = _pick_tile(Bp, _SUBLANE, tm // 2)

    grid = (Bp // tm, Np // tn, Kp // tk)

    kernel = _linear_clamp_kernel_scratch if use_scratch else _linear_clamp_kernel_inplace
    scratch = [pltpu.VMEM((tm, tn), jnp.float32)] if use_scratch else []

    cost = pl.CostEstimate(
        flops=2 * Bp * Np * Kp,
        transcendentals=0,
        bytes_accessed=(Bp * Kp + Kp * Np + Np) * in_size + Bp * Np * out_size,
    )

    out = pl.pallas_call(
        kernel,
        out_shape=jax.ShapeDtypeStruct((Bp, Np), out_dtype),
        grid_spec=pltpu.PrefetchScalarGridSpec(
            num_scalar_prefetch=0,
            grid=grid,
            in_specs=[
                pl.BlockSpec((tm, tk), lambda i, j, k: (i, k)),
                pl.BlockSpec((tk, tn), lambda i, j, k: (k, j)),
                pl.BlockSpec((1, tn), lambda i, j, k: (0, j)),
            ],
            out_specs=pl.BlockSpec((tm, tn), lambda i, j, k: (i, j)),
            scratch_shapes=scratch,
        ),
        compiler_params=pltpu.CompilerParams(
            dimension_semantics=("parallel", "parallel", "arbitrary")
        ),
        cost_estimate=cost,
    )(x, w_t, b)

    if (Bp, Np) != (B, N):
        out = out[:B, :N]
    return out


if __name__ == "__main__":
    # --- Test 1: shapes implied by Linear(in_features, out_features) on a
    # 2-D input: batch=8, in_features=32, out_features=16.
    batch, in_features, out_features = 8, 32, 16

    key = jax.random.PRNGKey(0)
    kx, kw, kb = jax.random.split(key, 3)

    x = jax.random.normal(kx, (batch, in_features), dtype=jnp.float32)
    bound = 1.0 / math.sqrt(in_features)   # PyTorch-style init bound
    w = jax.random.uniform(kw, (out_features, in_features),
                           minval=-bound, maxval=bound, dtype=jnp.float32)
    b = jax.random.uniform(kb, (out_features,),
                           minval=-bound, maxval=bound, dtype=jnp.float32)

    params = prepare_params(w, b)           # transpose + pad once, off hot path
    out = linear_clamp(x, params, use_pallas=True)   # force the Pallas path
    jax.block_until_ready(out)

    ref = jnp.clip(x @ w.T + b, MIN_VALUE, MAX_VALUE)
    assert out.shape == ref.shape
    assert jnp.allclose(out, ref, atol=1e-5, rtol=1e-5)

    # --- Test 2: multi-tile path (grid (2,2,2)), unaligned N, K-accumulation.
    B2, K2, N2 = 16, 256, 192
    kx2, kw2, kb2 = jax.random.split(jax.random.PRNGKey(1), 3)
    x2 = jax.random.normal(kx2, (B2, K2), dtype=jnp.float32)
    w2 = jax.random.uniform(kw2, (N2, K2), minval=-0.05, maxval=0.05,
                            dtype=jnp.float32)
    b2 = jax.random.uniform(kb2, (N2,), minval=-0.05, maxval=0.05,
                            dtype=jnp.float32)
    params2 = prepare_params(w2, b2)
    out2 = linear_clamp(x2, params2, tile_targets=(8, 128, 128), use_pallas=True)
    jax.block_until_ready(out2)
    ref2 = jnp.clip(x2 @ w2.T + b2, MIN_VALUE, MAX_VALUE)
    assert out2.shape == ref2.shape
    assert jnp.allclose(out2, ref2, atol=1e-5, rtol=1e-5)

    print("KERNEL_OK")
</pallas_src>

<mosaic_0001>
module attributes {stable_mosaic.version = 11 : i64} {
  func.func @_linear_clamp_kernel_inplace(%arg0: i32, %arg1: i32, %arg2: i32, %arg3: memref<8x128xf32, #tpu.memory_space<vmem>>, %arg4: memref<128x128xf32, #tpu.memory_space<vmem>>, %arg5: memref<1x128xf32, #tpu.memory_space<vmem>>, %arg6: memref<8x128xf32, #tpu.memory_space<vmem>>) attributes {dimension_semantics = [#tpu.dimension_semantics<parallel>, #tpu.dimension_semantics<parallel>, #tpu.dimension_semantics<arbitrary>], iteration_bounds = array<i64: 1, 1, 1>, scalar_prefetch = 0 : i64, scratch_operands = 0 : i64, tpu.core_type = #tpu.core_type<tc>, window_params = [{transform_indices = @transform_0, window_bounds = array<i64: 8, 128>}, {transform_indices = @transform_1, window_bounds = array<i64: 128, 128>}, {transform_indices = @transform_2, window_bounds = array<i64: 1, 128>}, {transform_indices = @transform_3, window_bounds = array<i64: 8, 128>}]} {
    %c0_i32 = arith.constant 0 : i32
    %0 = arith.cmpi eq, %arg2, %c0_i32 : i32
    %1 = arith.extui %0 : i1 to i32
    %c0_i32_0 = arith.constant 0 : i32
    %2 = arith.cmpi ne, %1, %c0_i32_0 : i32
    scf.if %2 {
      %cst_10 = arith.constant 0.000000e+00 : f32
      %12 = vector.broadcast %cst_10 : f32 to vector<8x128xf32>
      %c0_11 = arith.constant 0 : index
      %c0_12 = arith.constant 0 : index
      %13 = vector.load %arg6[%c0_11, %c0_12] : memref<8x128xf32, #tpu.memory_space<vmem>>, vector<8x128xf32>
      tpu.vector_store %arg6[%c0_11, %c0_12], %12 {strides = array<i32>} : memref<8x128xf32, #tpu.memory_space<vmem>>, vector<8x128xf32>,
    } else {
    }
    %c0 = arith.constant 0 : index
    %c0_1 = arith.constant 0 : index
    %3 = vector.load %arg6[%c0, %c0_1] : memref<8x128xf32, #tpu.memory_space<vmem>>, vector<8x128xf32>
    %c0_2 = arith.constant 0 : index
    %c0_3 = arith.constant 0 : index
    %4 = vector.load %arg3[%c0_2, %c0_3] : memref<8x128xf32, #tpu.memory_space<vmem>>, vector<8x128xf32>
    %c0_4 = arith.constant 0 : index
    %c0_5 = arith.constant 0 : index
    %5 = vector.load %arg4[%c0_4, %c0_5] : memref<128x128xf32, #tpu.memory_space<vmem>>, vector<128x128xf32>
    %cst = arith.constant dense<0.000000e+00> : vector<8x128xf32>
    %6 = tpu.matmul %4, %5, %cst {dimension_numbers = #tpu.dot_dimension_numbers<[1], [0], [0], [1], [0, 0, 1, 1], [], []>} : vector<8x128xf32>, vector<128x128xf32>, vector<8x128xf32> -> vector<8x128xf32>
    %7 = arith.addf %3, %6 : vector<8x128xf32>
    %c0_6 = arith.constant 0 : index
    %c0_7 = arith.constant 0 : index
    %8 = vector.load %arg6[%c0_6, %c0_7] : memref<8x128xf32, #tpu.memory_space<vmem>>, vector<8x128xf32>
    tpu.vector_store %arg6[%c0_6, %c0_7], %7 {strides = array<i32>} : memref<8x128xf32, #tpu.memory_space<vmem>>, vector<8x128xf32>,
    %c0_i32_8 = arith.constant 0 : i32
    %9 = arith.cmpi eq, %arg2, %c0_i32_8 : i32
    %10 = arith.extui %9 : i1 to i32
    %c0_i32_9 = arith.constant 0 : i32
    %11 = arith.cmpi ne, %10, %c0_i32_9 : i32
    scf.if %11 {
      %c0_10 = arith.constant 0 : index
      %c0_11 = arith.constant 0 : index
      %12 = vector.load %arg6[%c0_10, %c0_11] : memref<8x128xf32, #tpu.memory_space<vmem>>, vector<8x128xf32>
      %c0_12 = arith.constant 0 : index
      %c0_13 = arith.constant 0 : index
      %13 = vector.load %arg5[%c0_12, %c0_13] : memref<1x128xf32, #tpu.memory_space<vmem>>, vector<1x128xf32>
      %14 = vector.broadcast %13 : vector<1x128xf32> to vector<8x128xf32>
      %15 = arith.addf %12, %14 : vector<8x128xf32>
      %cst_14 = arith.constant 2.000000e-01 : f32
      %cst_15 = arith.constant 4.000000e-01 : f32
      %16 = vector.broadcast %cst_14 : f32 to vector<8x128xf32>
      %17 = arith.maximumf %16, %15 : vector<8x128xf32>
      %18 = vector.broadcast %cst_15 : f32 to vector<8x128xf32>
      %19 = arith.minimumf %18, %17 : vector<8x128xf32>
      %c0_16 = arith.constant 0 : index
      %c0_17 = arith.constant 0 : index
      %20 = vector.load %arg6[%c0_16, %c0_17] : memref<8x128xf32, #tpu.memory_space<vmem>>, vector<8x128xf32>
      tpu.vector_store %arg6[%c0_16, %c0_17], %19 {strides = array<i32>} : memref<8x128xf32, #tpu.memory_space<vmem>>, vector<8x128xf32>,
    } else {
    }
    return
  }
  func.func @transform_0(%arg0: i32, %arg1: i32, %arg2: i32) -> (i32, i32) {
    %c0_i32 = arith.constant 0 : i32
    return %arg0, %arg2 : i32, i32
  }
  func.func @transform_1(%arg0: i32, %arg1: i32, %arg2: i32) -> (i32, i32) {
    %c0_i32 = arith.constant 0 : i32
    return %arg2, %arg1 : i32, i32
  }
  func.func @transform_2(%arg0: i32, %arg1: i32, %arg2: i32) -> (i32, i32) {
    %c0_i32 = arith.constant 0 : i32
    %c0_i32_0 = arith.constant 0 : i32
    return %c0_i32, %arg1 : i32, i32
  }
  func.func @transform_3(%arg0: i32, %arg1: i32, %arg2: i32) -> (i32, i32) {
    %c0_i32 = arith.constant 0 : i32
    return %arg0, %arg1 : i32, i32
  }
}

</mosaic_0001>

<bundles_post_ra>
// kernel: tpu_custom_call.1
= control target key start
LH: loop header
LB: loop body
LE: loop exit
PB: predicated region body
PF: predicated region fallthrough
CT: control target
= control target key end

     0   :  { %8 = vsyncpa [#allocation3], 0  ;;  %s398_s0 = inlined_call_operand.hbm [shape: f32[8,128], index: 0, kind: input, shape index: {}]   ;;  %s399_s1 = inlined_call_operand.hbm [shape: f32[128,128], index: 1, kind: input, shape index: {}]   ;;  %s400_s2 = inlined_call_operand.vmem [shape: f32[1,128], index: 2, kind: input, shape index: {}]   ;;  %s401_s3 = inlined_call_operand.hbm [shape: f32[8,128], index: 3, kind: output, shape index: {}]  }
   0x1   :  { %9 = vsyncpa [#allocation6], 0 }
   0x2   :  { %10 = vsyncpa [#allocation4], 0  ;;  %s324_s12 = smov [#allocation2]   ;;  %s325_s14 = smov [#allocation5]  }
   0x3   :  { %s17_s13 = sshll.u32 %s324_s12, 4  ;;  %s26_s15 = sshll.u32 %s325_s14, 4  ;;  %s18_s13 = int_to_ptr.vmem [resolvable:$true] %s17_s13  ;;  %s352_s15 = int_to_ptr.vmem [resolvable:$true] %s26_s15 }
   0x4   :  { %s252_s18 = scalar_lea.hbm %s398_s0, 128 }
   0x5   :  { %p253_p0 = scmp.ne.s32.totalorder %s398_s0, %s252_s18  ;;  %p256_p1 = scmp.lt.u32.totalorder %s252_s18, %s398_s0 }
   0x7   :  { %p258_p2 = pnand %p256_p1, %p253_p0 }
   0x9   :  { %261 = shalt.err (!%p258_p2)
}
   0xa   :  { %s262_s23 = scalar_lea.vmem %s18_s13, 128  ;;  %p267_p4 = scmp.lt.s32.totalorder %s18_s13, %s18_s13 }
   0xb   :  { %p263_p3 = scmp.ne.s32.totalorder %s18_s13, %s262_s23  ;;  %p268_p5 = scmp.lt.s32.totalorder %s262_s23, %s262_s23 }
   0xd   :  { %p269_p6 = por %p268_p5, %p267_p4 }
   0xf   :  { %p270_p7 = pnand %p269_p6, %p263_p3 }
  0x11   :  { %273 = shalt.err (!%p270_p7)
}
  0x12   :  { %20 = dma.hbm_to_vmem [thread:$0]  %s398_s0, 128, %s18_s13, [#allocation3]  }
  0x13   :  { %s274_s28 = scalar_lea.hbm %s399_s1, 2048 }
  0x14   :  { %p275_p8 = scmp.ne.s32.totalorder %s399_s1, %s274_s28  ;;  %p278_p9 = scmp.lt.u32.totalorder %s274_s28, %s399_s1 }
  0x16   :  { %p280_p10 = pnand %p278_p9, %p275_p8 }
  0x18   :  { %283 = shalt.err (!%p280_p10)
}
  0x19   :  { %s284_s6 = scalar_lea.vmem %s352_s15, 2048  ;;  %p289_p12 = scmp.lt.s32.totalorder %s352_s15, %s352_s15 }
  0x1a   :  { %p285_p11 = scmp.ne.s32.totalorder %s352_s15, %s284_s6  ;;  %p290_p13 = scmp.lt.s32.totalorder %s284_s6, %s284_s6 }
  0x1c   :  { %p291_p0 = por %p290_p13, %p289_p12 }
  0x1e   :  { %p292_p1 = pnand %p291_p0, %p285_p11 }
  0x20   :  { %295 = shalt.err (!%p292_p1)
}
  0x21   :  { %s326_s0 = smov 128   ;;  %s327_s7 = smov 8  }
  0x22   :  { %32 = dma.hbm_to_vmem [thread:$0]  %s399_s1, 2048, %s352_s15, [#allocation6], %s326_s0, %s326_s0, %s327_s7  }
  0x23   :  { %318 = dma.done.wait [#allocation3], 128  }
  0x24   :  { %319 = vsyncadd [#allocation3], 4294967168 }
  0x25   :  { %320 = dma.done.wait [#allocation6], 2048  }
  0x26   :  { %321 = vsyncadd [#allocation6], 4294965248  ;;  %v328_v0 = vmov 0.0|0.0   ;;  %vm329_vm0 = vmmov 0   ;;  %v330_v1 = vmov 0.0   ;;  %v48_v2 = vld [vmem:[#allocation5] sm:$0xff] }
  0x27   :  { %220 = vmatprep.subr.bf16.mxu0 %v328_v0  ;;  %217 = vmatprep.mubr.msk.f32.mxu0 %vm329_vm0, %v330_v1  ;;  %v49_v3 = vld [vmem:[#allocation5 + $0x8] sm:$0xff]  ;;  %v50_v4 = vld [vmem:[#allocation5 + $0x10] sm:$0xff]  ;;  %v51_v6 = vld [vmem:[#allocation5 + $0x18] sm:$0xff]  ;;  %s331_s11 = smov [#allocation7]  }
  0x28   :  { %v221_v5 = vpack.c.bf16 %v49_v3, %v48_v2  ;;  %v224_v7 = vpack.c.bf16 %v51_v6, %v50_v4  ;;  %v52_v8 = vld [vmem:[#allocation5 + $0x20] sm:$0xff]  ;;  %v53_v9 = vld [vmem:[#allocation5 + $0x28] sm:$0xff]  ;;  %v54_v11 = vld [vmem:[#allocation5 + $0x30] sm:$0xff]  ;;  %s157_s12 = sshll.u32 %s331_s11, 4  ;;  %s158_s12 = int_to_ptr.vmem [resolvable:$true] %s157_s12 }
  0x29   :  { %v227_v10 = vpack.c.bf16 %v53_v9, %v52_v8  ;;  %v55_v12 = vld [vmem:[#allocation5 + $0x38] sm:$0xff]  ;;  %v56_v14 = vld [vmem:[#allocation5 + $0x40] sm:$0xff]  ;;  %v57_v15 = vld [vmem:[#allocation5 + $0x48] sm:$0xff]  ;;  %s296_s13 = scalar_lea.vmem %s158_s12, 128  ;;  %p301_p3 = scmp.lt.s32.totalorder %s158_s12, %s158_s12 }
  0x2a   :  { %222 = vmatpush3.bf16.msra.mxu0 %v221_v5  ;;  %v230_v13 = vpack.c.bf16 %v55_v12, %v54_v11  ;;  %v233_v16 = vpack.c.bf16 %v57_v15, %v56_v14  ;;  %v58_v17 = vld [vmem:[#allocation5 + $0x50] sm:$0xff]  ;;  %v59_v18 = vld [vmem:[#allocation5 + $0x58] sm:$0xff]  ;;  %v60_v20 = vld [vmem:[#allocation5 + $0x60] sm:$0xff]  ;;  %p297_p2 = scmp.ne.s32.totalorder %s158_s12, %s296_s13  ;;  %p302_p4 = scmp.lt.s32.totalorder %s296_s13, %s296_s13 }
  0x2b   :  { %223 = vmatprep.subr.bf16.mxu0 %v328_v0  ;;  %v236_v19 = vpack.c.bf16 %v59_v18, %v58_v17  ;;  %v61_v21 = vld [vmem:[#allocation5 + $0x68] sm:$0xff]  ;;  %v62_v23 = vld [vmem:[#allocation5 + $0x70] sm:$0xff]  ;;  %v63_v24 = vld [vmem:[#allocation5 + $0x78] sm:$0xff] }
  0x2c   :  { %v239_v22 = vpack.c.bf16 %v61_v21, %v60_v20  ;;  %v242_v25 = vpack.c.bf16 %v63_v24, %v62_v23  ;;  %v47_v26 = vld [vmem:[#allocation2] sm:$0xff]  ;;  %p303_p5 = por %p302_p4, %p301_p3 }
  0x2d   :  { %v167_v28 = vld [vmem:[%s400_s2] ss:$0 sm:$0xff] }
  0x2e   :  { %225 = vmatpush3.bf16.msra.mxu0 %v224_v7  ;;  %p304_p6 = pnand %p303_p5, %p297_p2 }
  0x2f   :  { %226 = vmatprep.subr.bf16.mxu0 %v328_v0 }
  0x32   :  { %228 = vmatpush3.bf16.msra.mxu0 %v227_v10 }
  0x33   :  { %229 = vmatprep.subr.bf16.mxu0 %v328_v0 }
  0x36   :  { %231 = vmatpush3.bf16.msra.mxu0 %v230_v13 }
  0x37   :  { %232 = vmatprep.subr.bf16.mxu0 %v328_v0 }
  0x3a   :  { %234 = vmatpush3.bf16.msra.mxu0 %v233_v16 }
  0x3b   :  { %235 = vmatprep.subr.bf16.mxu0 %v328_v0 }
  0x3e   :  { %237 = vmatpush3.bf16.msra.mxu0 %v236_v19 }
  0x3f   :  { %238 = vmatprep.subr.bf16.mxu0 %v328_v0 }
  0x42   :  { %240 = vmatpush3.bf16.msra.mxu0 %v239_v22 }
  0x43   :  { %241 = vmatprep.subr.bf16.mxu0 %v328_v0 }
  0x46   :  { %243 = vmatpush3.bf16.msra.mxu0 %v242_v25 }
  0x49   :  { %218 = vmatmul.mubr.f32.vlgmr.msra.gmra.mrb[0].mxu0 %v47_v26 }
 0x11c   :  { %v130_v27 = vpop.f32.mrb[0].mxu0 }
 0x11d   :  { %v219_v29 = vpop.f32.mrb[1].mxu0  ;;  %v147_v30 = vadd.f32 %v167_v28, %v130_v27 }
 0x11f   :  { %v148_v31 = vmax.f32 %v147_v30, 0.2 }
 0x121   :  { %v149_v32 = vmin.f32 %v148_v31, 0.4 }
 0x123   :  { %150 = vst [vmem:[#allocation7] sm:$0xff] %v149_v32 }
 0x124   :  { %307 = shalt.err (!%p304_p6)
}
 0x125   :  { %s308_s16 = scalar_lea.hbm %s401_s3, 128 }
 0x126   :  { %p309_p7 = scmp.ne.s32.totalorder %s401_s3, %s308_s16  ;;  %p312_p8 = scmp.lt.u32.totalorder %s308_s16, %s401_s3 }
 0x128   :  { %p314_p9 = pnand %p312_p8, %p309_p7 }
 0x12a   :  { %317 = shalt.err (!%p314_p9)
}
 0x12b   :  { %160 = dma.vmem_to_hbm [thread:$0]  %s158_s12, 128, %s401_s3, [#allocation4]  }
 0x12c   :  { %322 = dma.done.wait [#allocation4], 128  }
 0x12d   :  { %323 = vsyncadd [#allocation4], 4294967168 }
 0x12e   :  { %164 = vsyncpa [#allocation3], 1 }
 0x12f   :  { %165 = vsyncpa [#allocation6], 1 }
 0x130   :  { %166 = vsyncpa [#allocation4], 1 }

</bundles_post_ra>
